<compile_context>
chip_gen: v6e
topology: v6e:2x2x1
jax: 0.10.0
libtpu: 0.0.40
codegen_flags: <defaults>
</compile_context>

<pallas_src>
import functools

import jax
import jax.numpy as jnp
from jax.experimental import pallas as pl
from jax.experimental.pallas import tpu as pltpu


def _round_up(a, b):
    return ((a + b - 1) // b) * b


def _ffn_kernel(*refs, dropout_p, use_dropout):
    if use_dropout:
        x_ref, w1_ref, b1_ref, w2_ref, b2_ref, bits_ref, o_ref, acc_ref = refs
    else:
        x_ref, w1_ref, b1_ref, w2_ref, b2_ref, o_ref, acc_ref = refs
        bits_ref = None

    j = pl.program_id(1)

    # Linear 1 chunk (+ bias) + ReLU.  Operands stay in their (bf16) storage
    # dtype; accumulation is f32 on the MXU.
    h = jnp.dot(x_ref[...], w1_ref[...], preferred_element_type=jnp.float32)
    h = jnp.maximum(h + b1_ref[...].astype(jnp.float32), 0.0)          # (TM, TH)

    # Partial contribution of this hidden chunk to Linear 2 (f32 accumulate).
    part = jnp.dot(h.astype(w2_ref.dtype), w2_ref[...],
                   preferred_element_type=jnp.float32)                 # (TM, C)

    @pl.when(j == 0)
    def _():
        acc_ref[...] = jnp.zeros_like(acc_ref)

    acc_ref[...] += part

    @pl.when(j == pl.num_programs(1) - 1)
    def _():
        y = acc_ref[...] + b2_ref[...].astype(jnp.float32)
        if use_dropout:
            # Inverted dropout via raw uint32 threshold compare (constants are
            # baked at trace time; no bits->float conversion).
            thr = jnp.uint32(min(int(dropout_p * (1 << 32)), (1 << 32) - 1))
            scale = 1.0 / (1.0 - dropout_p)
            keep = bits_ref[...] >= thr                  # P(drop) == dropout_p
            y = jnp.where(keep, y * scale, 0.0)
        o_ref[...] = y.astype(o_ref.dtype)


def _choose_tiles(M, C, H, in_bytes, out_bytes, use_dropout):
    """Pick (TM, padded M, TH, vmem estimate)."""
    # Row tile: MXU-friendly for large M, multiple of 8 otherwise, and always
    # >= 2 grid steps so a v7x megacore can split the "parallel" row axis.
    if M >= 1024:
        tm = 512
    elif M >= 512:
        tm = 256
    else:
        tm = max(8, _round_up(pl.cdiv(M, 2), 8))
    n_row = max(2, pl.cdiv(M, tm))
    m_pad = n_row * tm

    # Hidden tile: keep w1/w2/h resident when they fit; otherwise stream the
    # hidden axis in 256-multiples (reduction axis, marked "arbitrary").
    def est(th_):
        e = 2 * tm * C * (in_bytes + out_bytes)        # x / out double buffers
        e += 2 * (C * th_ + th_ * C) * in_bytes        # w1 / w2 block buffers
        e += 2 * (th_ + C) * 4                         # bias buffers
        e += tm * C * 4                                # f32 accumulator scratch
        e += 2 * tm * th_ * 4                          # h intermediate + slack
        if use_dropout:
            e += 2 * tm * C * 4                        # dropout bits buffers
        return e

    th = H
    budget = 48 * 1024 * 1024
    while est(th) > budget and th % 512 == 0 and (th // 2) % 256 == 0:
        th //= 2
    return tm, m_pad, th, est(th)


@functools.partial(jax.jit,
                   static_argnames=("dropout_p", "training", "compute_dtype"))
def feedforward(x, w1, b1, w2, b2, dropout_key=None, *, dropout_p=0.2,
                training=False, compute_dtype=jnp.bfloat16):
    """y = Dropout(ReLU(x @ w1 + b1) @ w2 + b2).  w1: (C, 4C), w2: (4C, C)."""
    orig_shape = x.shape
    out_dtype = x.dtype
    C = orig_shape[-1]
    H = w1.shape[1]
    M = 1
    for d in orig_shape[:-1]:
        M *= d

    use_dropout = bool(training) and dropout_p > 0.0

    # bf16 MXU operands (accumulation stays f32 inside the kernel).
    cd = jnp.dtype(compute_dtype)
    x2 = x.reshape(M, C).astype(cd)
    w1c = w1.astype(cd)
    w2c = w2.astype(cd)
    b1r = b1.reshape(1, H).astype(jnp.float32)
    b2r = b2.reshape(1, C).astype(jnp.float32)

    in_bytes = cd.itemsize
    out_bytes = jnp.dtype(out_dtype).itemsize
    TM, M_pad, TH, vmem_est = _choose_tiles(M, C, H, in_bytes, out_bytes,
                                            use_dropout)
    if M_pad != M:
        x2 = jnp.pad(x2, ((0, M_pad - M), (0, 0)))

    grid = (M_pad // TM, H // TH)

    in_specs = [
        pl.BlockSpec((TM, C), lambda i, j: (i, 0)),     # x rows
        pl.BlockSpec((C, TH), lambda i, j: (0, j)),     # w1 hidden chunk
        pl.BlockSpec((1, TH), lambda i, j: (0, j)),     # b1 hidden chunk
        pl.BlockSpec((TH, C), lambda i, j: (j, 0)),     # w2 hidden chunk
        pl.BlockSpec((1, C), lambda i, j: (0, 0)),      # b2
    ]
    args = [x2, w1c, b1r, w2c, b2r]

    if use_dropout:
        # TODO(synk): matches the dropout distribution, not torch's RNG stream;
        # bits come from jax.random in the wrapper because pltpu.prng_* has no
        # CPU/interpret lowering.
        bits = jax.random.bits(dropout_key, (M_pad, C), dtype=jnp.uint32)
        in_specs.append(pl.BlockSpec((TM, C), lambda i, j: (i, 0)))
        args.append(bits)

    kernel = functools.partial(_ffn_kernel, dropout_p=float(dropout_p),
                               use_dropout=use_dropout)

    flops = 4 * M_pad * C * H                           # two matmuls, 2 flop/MAC
    bytes_accessed = (M_pad * C * (in_bytes + out_bytes)
                      + 2 * C * H * in_bytes + (H + C) * 4
                      + (M_pad * C * 4 if use_dropout else 0))

    out = pl.pallas_call(
        kernel,
        out_shape=jax.ShapeDtypeStruct((M_pad, C), out_dtype),
        grid_spec=pltpu.PrefetchScalarGridSpec(
            num_scalar_prefetch=0,
            grid=grid,
            in_specs=in_specs,
            out_specs=pl.BlockSpec((TM, C), lambda i, j: (i, 0)),
            scratch_shapes=[pltpu.VMEM((TM, C), jnp.float32)],
        ),
        compiler_params=pltpu.CompilerParams(
            dimension_semantics=("parallel", "arbitrary"),
            vmem_limit_bytes=int(min(max(vmem_est + (8 << 20), 32 << 20),
                                     56 << 20)),
        ),
        cost_estimate=pl.CostEstimate(
            flops=flops, transcendentals=0, bytes_accessed=bytes_accessed),
    )(*args)

    return out[:M].reshape(orig_shape)


if __name__ == "__main__":
    # FeedForward(n_emb=128): batch=2, seq=8, n_emb=128, hidden=512.
    B, T, C = 2, 8, 128
    H = 4 * C
    P = 0.2

    key = jax.random.PRNGKey(0)
    kx, k1, kb1, k2, kb2, kdrop = jax.random.split(key, 6)
    x = jax.random.normal(kx, (B, T, C), dtype=jnp.float32)

    # torch.nn.Linear-style init U(-1/sqrt(fan_in), 1/sqrt(fan_in)),
    # weights stored pre-transposed as (in, out).
    bnd1 = 1.0 / (C ** 0.5)
    bnd2 = 1.0 / (H ** 0.5)
    w1 = jax.random.uniform(k1, (C, H), jnp.float32, -bnd1, bnd1)
    b1 = jax.random.uniform(kb1, (H,), jnp.float32, -bnd1, bnd1)
    w2 = jax.random.uniform(k2, (H, C), jnp.float32, -bnd2, bnd2)
    b2 = jax.random.uniform(kb2, (C,), jnp.float32, -bnd2, bnd2)

    # Eval mode (dropout = identity).
    out = feedforward(x, w1, b1, w2, b2, dropout_p=P, training=False)
    out = jax.block_until_ready(out)
    assert out.shape == (B, T, C)

    # Reference with matching bf16-operand / f32-accumulate arithmetic.
    x2 = x.reshape(B * T, C).astype(jnp.bfloat16)
    h_ref = jnp.maximum(
        jnp.dot(x2, w1.astype(jnp.bfloat16),
                preferred_element_type=jnp.float32) + b1, 0.0)
    ref = (jnp.dot(h_ref.astype(jnp.bfloat16), w2.astype(jnp.bfloat16),
                   preferred_element_type=jnp.float32) + b2).reshape(B, T, C)
    err = float(jnp.max(jnp.abs(out - ref)))
    assert jnp.allclose(out, ref, atol=1e-2, rtol=1e-2), err

    # Training mode: inverted dropout (drop rate ~ P, survivors scaled 1/(1-P)).
    out_tr = feedforward(x, w1, b1, w2, b2, kdrop, dropout_p=P, training=True)
    out_tr = jax.block_until_ready(out_tr)
    zero_frac = float(jnp.mean((out_tr == 0.0).astype(jnp.float32)))
    assert 0.08 < zero_frac < 0.35, zero_frac
    kept = out_tr != 0.0
    assert jnp.allclose(jnp.where(kept, out_tr, 0.0),
                        jnp.where(kept, ref / (1.0 - P), 0.0),
                        atol=2e-2, rtol=2e-2)

    print("KERNEL_OK")
</pallas_src>

<mosaic_0001>
module attributes {stable_mosaic.version = 11 : i64} {
  func.func @_ffn_kernel(%arg0: i32, %arg1: i32, %arg2: memref<8x128xbf16, #tpu.memory_space<vmem>>, %arg3: memref<128x512xbf16, #tpu.memory_space<vmem>>, %arg4: memref<1x512xf32, #tpu.memory_space<vmem>>, %arg5: memref<512x128xbf16, #tpu.memory_space<vmem>>, %arg6: memref<1x128xf32, #tpu.memory_space<vmem>>, %arg7: memref<8x128xf32, #tpu.memory_space<vmem>>, %arg8: memref<8x128xf32, #tpu.memory_space<vmem>>) attributes {dimension_semantics = [#tpu.dimension_semantics<parallel>, #tpu.dimension_semantics<arbitrary>], iteration_bounds = array<i64: 2, 1>, scalar_prefetch = 0 : i64, scratch_operands = 1 : i64, tpu.core_type = #tpu.core_type<tc>, window_params = [{transform_indices = @transform_0, window_bounds = array<i64: 8, 128>}, {transform_indices = @transform_1, window_bounds = array<i64: 128, 512>}, {transform_indices = @transform_2, window_bounds = array<i64: 1, 512>}, {transform_indices = @transform_3, window_bounds = array<i64: 512, 128>}, {pipeline_mode = #tpu.pipeline_mode<synchronous>, transform_indices = @transform_4, window_bounds = array<i64: 1, 128>}, {transform_indices = @transform_5, window_bounds = array<i64: 8, 128>}]} {
    %c0 = arith.constant 0 : index
    %c0_0 = arith.constant 0 : index
    %0 = vector.load %arg2[%c0, %c0_0] : memref<8x128xbf16, #tpu.memory_space<vmem>>, vector<8x128xbf16>
    %c0_1 = arith.constant 0 : index
    %c0_2 = arith.constant 0 : index
    %1 = vector.load %arg3[%c0_1, %c0_2] : memref<128x512xbf16, #tpu.memory_space<vmem>>, vector<128x512xbf16>
    %cst = arith.constant dense<0.000000e+00> : vector<8x512xf32>
    %2 = tpu.matmul %0, %1, %cst {dimension_numbers = #tpu.dot_dimension_numbers<[1], [0], [0], [1], [0, 0, 1, 1], [], []>} : vector<8x128xbf16>, vector<128x512xbf16>, vector<8x512xf32> -> vector<8x512xf32>
    %c0_3 = arith.constant 0 : index
    %c0_4 = arith.constant 0 : index
    %3 = vector.load %arg4[%c0_3, %c0_4] : memref<1x512xf32, #tpu.memory_space<vmem>>, vector<1x512xf32>
    %4 = vector.broadcast %3 : vector<1x512xf32> to vector<8x512xf32>
    %5 = arith.addf %2, %4 : vector<8x512xf32>
    %cst_5 = arith.constant 0.000000e+00 : f32
    %6 = vector.broadcast %cst_5 : f32 to vector<8x512xf32>
    %7 = arith.maximumf %5, %6 : vector<8x512xf32>
    %8 = arith.truncf %7 : vector<8x512xf32> to vector<8x512xbf16>
    %c0_6 = arith.constant 0 : index
    %c0_7 = arith.constant 0 : index
    %9 = vector.load %arg5[%c0_6, %c0_7] : memref<512x128xbf16, #tpu.memory_space<vmem>>, vector<512x128xbf16>
    %cst_8 = arith.constant dense<0.000000e+00> : vector<8x128xf32>
    %10 = tpu.matmul %8, %9, %cst_8 {dimension_numbers = #tpu.dot_dimension_numbers<[1], [0], [0], [1], [0, 0, 1, 1], [], []>} : vector<8x512xbf16>, vector<512x128xbf16>, vector<8x128xf32> -> vector<8x128xf32>
    %c0_i32 = arith.constant 0 : i32
    %11 = arith.cmpi eq, %arg1, %c0_i32 : i32
    %12 = arith.extui %11 : i1 to i32
    %c0_i32_9 = arith.constant 0 : i32
    %13 = arith.cmpi ne, %12, %c0_i32_9 : i32
    scf.if %13 {
      %cst_16 = arith.constant 0.000000e+00 : f32
      %20 = vector.broadcast %cst_16 : f32 to vector<8x128xf32>
      %c0_17 = arith.constant 0 : index
      %c0_18 = arith.constant 0 : index
      %21 = vector.load %arg8[%c0_17, %c0_18] : memref<8x128xf32, #tpu.memory_space<vmem>>, vector<8x128xf32>
      tpu.vector_store %arg8[%c0_17, %c0_18], %20 {strides = array<i32>} : memref<8x128xf32, #tpu.memory_space<vmem>>, vector<8x128xf32>,
    } else {
    }
    %c0_10 = arith.constant 0 : index
    %c0_11 = arith.constant 0 : index
    %14 = vector.load %arg8[%c0_10, %c0_11] : memref<8x128xf32, #tpu.memory_space<vmem>>, vector<8x128xf32>
    %15 = arith.addf %14, %10 : vector<8x128xf32>
    %c0_12 = arith.constant 0 : index
    %c0_13 = arith.constant 0 : index
    %16 = vector.load %arg8[%c0_12, %c0_13] : memref<8x128xf32, #tpu.memory_space<vmem>>, vector<8x128xf32>
    tpu.vector_store %arg8[%c0_12, %c0_13], %15 {strides = array<i32>} : memref<8x128xf32, #tpu.memory_space<vmem>>, vector<8x128xf32>,
    %c0_i32_14 = arith.constant 0 : i32
    %17 = arith.cmpi eq, %arg1, %c0_i32_14 : i32
    %18 = arith.extui %17 : i1 to i32
    %c0_i32_15 = arith.constant 0 : i32
    %19 = arith.cmpi ne, %18, %c0_i32_15 : i32
    scf.if %19 {
      %c0_16 = arith.constant 0 : index
      %c0_17 = arith.constant 0 : index
      %20 = vector.load %arg8[%c0_16, %c0_17] : memref<8x128xf32, #tpu.memory_space<vmem>>, vector<8x128xf32>
      %c0_18 = arith.constant 0 : index
      %c0_19 = arith.constant 0 : index
      %21 = vector.load %arg6[%c0_18, %c0_19] : memref<1x128xf32, #tpu.memory_space<vmem>>, vector<1x128xf32>
      %22 = vector.broadcast %21 : vector<1x128xf32> to vector<8x128xf32>
      %23 = arith.addf %20, %22 : vector<8x128xf32>
      %c0_20 = arith.constant 0 : index
      %c0_21 = arith.constant 0 : index
      %24 = vector.load %arg7[%c0_20, %c0_21] : memref<8x128xf32, #tpu.memory_space<vmem>>, vector<8x128xf32>
      tpu.vector_store %arg7[%c0_20, %c0_21], %23 {strides = array<i32>} : memref<8x128xf32, #tpu.memory_space<vmem>>, vector<8x128xf32>,
    } else {
    }
    return
  }
  func.func @transform_0(%arg0: i32, %arg1: i32) -> (i32, i32) {
    %c0_i32 = arith.constant 0 : i32
    %c0_i32_0 = arith.constant 0 : i32
    return %arg0, %c0_i32 : i32, i32
  }
  func.func @transform_1(%arg0: i32, %arg1: i32) -> (i32, i32) {
    %c0_i32 = arith.constant 0 : i32
    %c0_i32_0 = arith.constant 0 : i32
    return %c0_i32, %arg1 : i32, i32
  }
  func.func @transform_2(%arg0: i32, %arg1: i32) -> (i32, i32) {
    %c0_i32 = arith.constant 0 : i32
    %c0_i32_0 = arith.constant 0 : i32
    return %c0_i32, %arg1 : i32, i32
  }
  func.func @transform_3(%arg0: i32, %arg1: i32) -> (i32, i32) {
    %c0_i32 = arith.constant 0 : i32
    %c0_i32_0 = arith.constant 0 : i32
    return %arg1, %c0_i32 : i32, i32
  }
  func.func @transform_4(%arg0: i32, %arg1: i32) -> (i32, i32) {
    %c0_i32 = arith.constant 0 : i32
    %c0_i32_0 = arith.constant 0 : i32
    %c0_i32_1 = arith.constant 0 : i32
    return %c0_i32, %c0_i32_0 : i32, i32
  }
  func.func @transform_5(%arg0: i32, %arg1: i32) -> (i32, i32) {
    %c0_i32 = arith.constant 0 : i32
    %c0_i32_0 = arith.constant 0 : i32
    return %arg0, %c0_i32 : i32, i32
  }
}

</mosaic_0001>

<bundles_post_ra>
// kernel: feedforward.1
= control target key start
LH: loop header
LB: loop body
LE: loop exit
PB: predicated region body
PF: predicated region fallthrough
CT: control target
= control target key end

     0   :  { %10 = vsyncpa [#allocation4], 0  ;;  %s1747_s0 = inlined_call_operand.vmem [shape: bf16[16,128], index: 0, kind: input, shape index: {}]   ;;  %s1748_s1 = inlined_call_operand.vmem [shape: bf16[128,512], index: 1, kind: input, shape index: {}]   ;;  %s1749_s2 = inlined_call_operand.vmem [shape: f32[1,512], index: 2, kind: input, shape index: {}]   ;;  %s1750_s3 = inlined_call_operand.vmem [shape: bf16[512,128], index: 3, kind: input, shape index: {}]   ;;  %s1751_s4 = inlined_call_operand.vmem [shape: f32[1,128], index: 4, kind: input, shape index: {}]   ;;  %s1752_s5 = inlined_call_operand.hbm [shape: f32[16,128], index: 5, kind: output, shape index: {}]  }
   0x1   :  { %12 = vsyncpa [#allocation4 + $0x1], 0  ;;  %s1450_s18 = smov 0   ;;  %s1452_s19 = smov 0  }
   0x2   :  { %s1454_s20 = smov 0   ;;  %s1456_s21 = smov 0  }
   0x3   :  { %s1458_s22 = smov 0   ;;  %s1460_s23 = smov 0  }
   0x4 LB: > { %s1081_s24 = sadd.s32 4294967295, %s1416_s23   ;;  %s1082_s25 = sadd.s32 4294967294, %s1416_s23   ;;  %s1416_s23 = sphi %s1460_s23, %s18_s23   ;;  %s1412_s22 = sphi %s1458_s22, %s1759_s22   ;;  %s1408_s21 = sphi %s1456_s21, %s1758_s21   ;;  %s1404_s20 = sphi %s1454_s20, %s1757_s20   ;;  %s1400_s19 = sphi %s1452_s19, %s1756_s19   ;;  %s1396_s18 = sphi %s1450_s18, %s1755_s18  }
   0x5   : > { %s30_s26 = sadd.s32 1, %s1412_s22  ;;  %s162_s27 = sadd.s32 1, %s1404_s20 }
   0x6   : > { %p32_p0 = scmp.ge.s32.totalorder %s30_s26, 2  ;;  %p172_p1 = scmp.ne.s32.totalorder %s1404_s20, %s1400_s19 }
   0x7   : > { %p173_p2 = scmp.eq.s32.totalorder %s1081_s24, 1  ;;  %p178_p3 = scmp.ne.s32.totalorder %s1400_s19, %s1396_s18 }
   0x8   : > { %s1761_s26 = smov (%p32_p0, %s30_s26), 0  ;;  %p179_p5 = scmp.eq.s32.totalorder %s1082_s25, 1 }
   0x9   : > { %p1490_p4 = por %p173_p2, %p172_p1  ;;  %s159_s29 = ssub.s32 %s1412_s22, %s1761_s26 }
   0xa   : > { %p1088_p6 = scmp.ge.s32.totalorder %s1416_s23, 1  ;;  %p160_p7 = scmp.eq.s32.totalorder %s159_s29, 0 }
   0xb   : > { %p1497_p8 = por %p179_p5, %p178_p3  ;;  %p233_p9 = scmp.lt.s32.totalorder %s1416_s23, 3 }
   0xc   : > { %s1503_s6 = scalar_select %p160_p7, %s1404_s20, %s162_s27  }
   0xd   : > { %p234_p10 = pnand %p1088_p6, %p233_p9 }
   0xe   : > { %p274_p11 = scmp.lt.s32.totalorder (!%p234_p10), %s1408_s21, 1  ;;  %s271_s8 = sand.u32 (!%p234_p10), 1, %s1400_s19  }
   0xf   : > { %237 = sbr.rel (%p234_p10) target bundleno = 470 (0x1d6), region = 40  ;;  %s1089_s9 = sshll.u32 (!%p234_p10), %s271_s8, 3 }
  0x10   : > { %s1157_s12 = sshll.u32 (!%p234_p10), %s1408_s21, 7  ;;  %s273_s13 = scalar_lea.vmem (!%p234_p10), [#allocation3], %s1089_s9 }
  0x11   : > { %s972_s14 = sshll.u32 (!%p234_p10), %s273_s13, 4  ;;  %s970_s17 = scalar_lea.hbm (!%p234_p10), %s1752_s5, %s1157_s12  ;;  %s973_s14 = int_to_ptr.vmem [resolvable:$true] %s972_s14 }
  0x12   : > { %s959_s24 = scalar_lea.sflag (!%p234_p10), [#allocation4], %s271_s8  ;;  %s1340_s27 = scalar_lea.vmem (!%p234_p10), %s973_s14, 128 }
  0x13   : > { %p1341_p12 = scmp.ne.s32.totalorder (!%p234_p10), %s973_s14, %s1340_s27 }
  0x14   : > { %v1260_v0 = vld [vmem:[%s1748_s1 + $0xe4] ss:$16 sps:$4 sm:$0xff]   ;;  %v1262_v1 = vld [vmem:[%s1748_s1 + $0xec] ss:$16 sps:$4 sm:$0xff]   ;;  %v1418_v2 = vmov 0   ;;  %s275_s25 = scalar_select %p274_p11, %s1408_s21, 1 }
  0x15   : > { %543 = vmatprep.mubr.bf16.mxu0 %v1418_v2  ;;  %584 = vmatprep.mubr.bf16.mxu1 %v1418_v2  ;;  %v1264_v3 = vld [vmem:[%s1748_s1 + $0xe0] ss:$16 sps:$4 sm:$0xff]   ;;  %v1265_v4 = vld [vmem:[%s1748_s1 + $0xe8] ss:$16 sps:$4 sm:$0xff]   ;;  %v1266_v5 = vld [vmem:[%s1748_s1 + $0xc4] ss:$16 sps:$4 sm:$0xff]   ;;  %v331_v2 = vlaneseq  ;;  %p1342_p13 = pnand %p1341_p12, %p1490_p4 }
  0x16   : > { %511 = vmatprep.subr.bf16.mxu0 %v1260_v0  ;;  %552 = vmatprep.subr.bf16.mxu1 %v1262_v1  ;;  %v1268_v6 = vld [vmem:[%s1748_s1 + $0xcc] ss:$16 sps:$4 sm:$0xff]   ;;  %v1270_v7 = vld [vmem:[%s1748_s1 + $0xc0] ss:$16 sps:$4 sm:$0xff]   ;;  %v1271_v8 = vld [vmem:[%s1748_s1 + $0xc8] ss:$16 sps:$4 sm:$0xff]  }
  0x17   : > { %512 = vmatpush1.bf16.msra.mxu0 %v1264_v3  ;;  %553 = vmatpush1.bf16.msra.mxu1 %v1265_v4  ;;  %v1272_v9 = vld [vmem:[%s1748_s1 + $0xa4] ss:$16 sps:$4 sm:$0xff]   ;;  %v1274_v10 = vld [vmem:[%s1748_s1 + $0xac] ss:$16 sps:$4 sm:$0xff]   ;;  %v1276_v11 = vld [vmem:[%s1748_s1 + $0xa0] ss:$16 sps:$4 sm:$0xff]   ;;  %p1343_p0 = pneg %p1342_p13 }
  0x18   : > { %513 = vmatprep.subr.bf16.mxu0 %v1266_v5  ;;  %554 = vmatprep.subr.bf16.mxu1 %v1268_v6  ;;  %v1277_v12 = vld [vmem:[%s1748_s1 + $0xa8] ss:$16 sps:$4 sm:$0xff]   ;;  %v1278_v13 = vld [vmem:[%s1748_s1 + $0x84] ss:$16 sps:$4 sm:$0xff]   ;;  %v1280_v14 = vld [vmem:[%s1748_s1 + $0x8c] ss:$16 sps:$4 sm:$0xff]  }
  0x19   : > { %v1282_v15 = vld [vmem:[%s1748_s1 + $0x80] ss:$16 sps:$4 sm:$0xff]   ;;  %v1283_v16 = vld [vmem:[%s1748_s1 + $0x88] ss:$16 sps:$4 sm:$0xff]   ;;  %v1284_v17 = vld [vmem:[%s1748_s1 + $0x64] ss:$16 sps:$4 sm:$0xff]  }
  0x1a   : > { %v1286_v18 = vld [vmem:[%s1748_s1 + $0x6c] ss:$16 sps:$4 sm:$0xff]   ;;  %v1288_v19 = vld [vmem:[%s1748_s1 + $0x60] ss:$16 sps:$4 sm:$0xff]   ;;  %v1289_v20 = vld [vmem:[%s1748_s1 + $0x68] ss:$16 sps:$4 sm:$0xff]  }
  0x1b   : > { %514 = vmatpush1.bf16.msra.mxu0 %v1270_v7  ;;  %555 = vmatpush1.bf16.msra.mxu1 %v1271_v8  ;;  %v1290_v21 = vld [vmem:[%s1748_s1 + $0x44] ss:$16 sps:$4 sm:$0xff]   ;;  %v1292_v22 = vld [vmem:[%s1748_s1 + $0x4c] ss:$16 sps:$4 sm:$0xff]   ;;  %v1294_v23 = vld [vmem:[%s1748_s1 + $0x40] ss:$16 sps:$4 sm:$0xff]  }
  0x1c   : > { %515 = vmatprep.subr.bf16.mxu0 %v1272_v9  ;;  %556 = vmatprep.subr.bf16.mxu1 %v1274_v10  ;;  %v1295_v24 = vld [vmem:[%s1748_s1 + $0x48] ss:$16 sps:$4 sm:$0xff]   ;;  %s1090_s11 = sshll.u32 %s275_s25, 2  ;;  %v1296_v25 = vld [vmem:[%s1748_s1 + $0x24] ss:$16 sps:$4 sm:$0xff]   ;;  %v332_v3 = vshrl.u32 %v331_v2, 7 }
  0x1d   : > { %v1298_v26 = vld [vmem:[%s1748_s1 + $0x2c] ss:$16 sps:$4 sm:$0xff]   ;;  %v1300_v27 = vld [vmem:[%s1748_s1 + $0x20] ss:$16 sps:$4 sm:$0xff]   ;;  %v1301_v28 = vld [vmem:[%s1748_s1 + $0x28] ss:$16 sps:$4 sm:$0xff]   ;;  %s277_s16 = scalar_lea.vmem %s1747_s0, %s1090_s11 }
  0x1e   : > { %v1302_v29 = vld [vmem:[%s1748_s1 + $0x4] ss:$16 sps:$4 sm:$0xff]   ;;  %v1304_v30 = vld [vmem:[%s1748_s1 + $0xc] ss:$16 sps:$4 sm:$0xff]   ;;  %v1306_v31 = vld [vmem:[%s1748_s1] ss:$16 sps:$4 sm:$0xff]  }
  0x1f   : > { %516 = vmatpush1.bf16.msra.mxu0 %v1276_v11  ;;  %557 = vmatpush1.bf16.msra.mxu1 %v1277_v12  ;;  %v1307_v32 = vld [vmem:[%s1748_s1 + $0x8] ss:$16 sps:$4 sm:$0xff]   ;;  %v296_v35 = vld [vmem:[%s277_s16] sm:$0xf]  ;;  %v1312_v38 = vld [vmem:[%s1750_s3 + $0x70] sm:$0xff]   ;;  %v333_v4 = vsub.s32 0, %v332_v3 }
  0x20   : > { %517 = vmatprep.subr.bf16.mxu0 %v1278_v13  ;;  %558 = vmatprep.subr.bf16.mxu1 %v1280_v14  ;;  %v1308_v33 = vld [vmem:[%s1750_s3 + $0x78] sm:$0xff]   ;;  %v1313_v39 = vld [vmem:[%s1750_s3 + $0xf0] sm:$0xff]   ;;  %v1316_v42 = vld [vmem:[%s1750_s3 + $0x68] sm:$0xff]   ;;  %v341_v5 = vsub.s32 2, %v332_v3  ;;  %v337_v7 = vsub.s32 1, %v332_v3  ;;  %v345_v8 = vsub.s32 3, %v332_v3 }
  0x21   : > { %v1309_v34 = vld [vmem:[%s1750_s3 + $0xf8] sm:$0xff]   ;;  %v1314_v40 = vld [vmem:[%s1750_s3 + $0x30] sm:$0xff]   ;;  %v1317_v43 = vld [vmem:[%s1750_s3 + $0xe8] sm:$0xff]   ;;  %s1419_s25 = smov [#allocation3]  }
  0x22   : > { %v1310_v36 = vld [vmem:[%s1750_s3 + $0x38] sm:$0xff]   ;;  %v1315_v41 = vld [vmem:[%s1750_s3 + $0xb0] sm:$0xff]   ;;  %v1318_v44 = vld [vmem:[%s1750_s3 + $0x28] sm:$0xff]   ;;  %s1344_s21 = sshll.u32 %s1419_s25, 4  ;;  %s1345_s21 = int_to_ptr.vmem [resolvable:$false] %s1344_s21 }
  0x23   : > { %518 = vmatpush1.bf16.msra.mxu0 %v1282_v15  ;;  %559 = vmatpush1.bf16.msra.mxu1 %v1283_v16  ;;  %v1311_v37 = vld [vmem:[%s1750_s3 + $0xb8] sm:$0xff]   ;;  %v1319_v45 = vld [vmem:[%s1750_s3 + $0xa8] sm:$0xff]   ;;  %v1320_v46 = vld [vmem:[%s1750_s3 + $0x60] sm:$0xff]   ;;  %s1346_s29 = scalar_lea.vmem %s1345_s21, 256  ;;  %p1347_p1 = scmp.lt.s32.totalorder %s973_s14, %s1345_s21 }
  0x24   : > { %519 = vmatprep.subr.bf16.mxu0 %v1284_v17  ;;  %560 = vmatprep.subr.bf16.mxu1 %v1286_v18  ;;  %v1321_v47 = vld [vmem:[%s1750_s3 + $0xe0] sm:$0xff]   ;;  %v1324_v50 = vld [vmem:[%s1750_s3 + $0x58] sm:$0xff]   ;;  %v1328_v54 = vld [vmem:[%s1750_s3 + $0x50] sm:$0xff]   ;;  %p1348_p2 = scmp.lt.s32.totalorder %s1346_s29, %s1340_s27 }
  0x25   : > { %v1322_v48 = vld [vmem:[%s1750_s3 + $0x20] sm:$0xff]   ;;  %v1325_v51 = vld [vmem:[%s1750_s3 + $0xd8] sm:$0xff]   ;;  %v1329_v55 = vld [vmem:[%s1750_s3 + $0xd0] sm:$0xff]  }
  0x26   : > { %v1323_v49 = vld [vmem:[%s1750_s3 + $0xa0] sm:$0xff]   ;;  %v1326_v52 = vld [vmem:[%s1750_s3 + $0x18] sm:$0xff]   ;;  %v1330_v56 = vld [vmem:[%s1750_s3 + $0x10] sm:$0xff]   ;;  %p1349_p3 = por %p1348_p2, %p1347_p1 }
  0x27   : > { %520 = vmatpush1.bf16.msra.mxu0 %v1288_v19  ;;  %561 = vmatpush1.bf16.msra.mxu1 %v1289_v20  ;;  %v1327_v53 = vld [vmem:[%s1750_s3 + $0x98] sm:$0xff]   ;;  %v1331_v57 = vld [vmem:[%s1750_s3 + $0x90] sm:$0xff]   ;;  %v1332_v58 = vld [vmem:[%s1750_s3 + $0x48] sm:$0xff]  }
  0x28   : > { %521 = vmatprep.subr.bf16.mxu0 %v1290_v21  ;;  %562 = vmatprep.subr.bf16.mxu1 %v1292_v22  ;;  %v1333_v59 = vld [vmem:[%s1750_s3 + $0xc8] sm:$0xff]   ;;  %v1336_v62 = vld [vmem:[%s1750_s3 + $0x40] sm:$0xff]   ;;  %p1350_p5 = pnand %p1349_p3, %p1343_p0 }
  0x29   : > { %v1334_v60 = vld [vmem:[%s1750_s3 + $0x8] sm:$0xff]   ;;  %v1337_v63 = vld [vmem:[%s1750_s3 + $0xc0] sm:$0xff]  }
  0x2a   : > { %v1335_v61 = vld [vmem:[%s1750_s3 + $0x88] sm:$0xff]   ;;  %v1338_v0 = vld [vmem:[%s1750_s3] sm:$0xff]  }
  0x2b   : > { %522 = vmatpush1.bf16.msra.mxu0 %v1294_v23  ;;  %563 = vmatpush1.bf16.msra.mxu1 %v1295_v24  ;;  %v1339_v1 = vld [vmem:[%s1750_s3 + $0x80] sm:$0xff]  }
  0x2c   : > { %523 = vmatprep.subr.bf16.mxu0 %v1296_v25  ;;  %564 = vmatprep.subr.bf16.mxu1 %v1298_v26  ;;  %v329_v6 = vld [vmem:[%s1749_s2] sm:$0xf] }
  0x2d   : > { %v334_v9 = vrot.slane %v329_v6, %v333_v4  ;;  %v342_v10 = vrot.slane %v329_v6, %v341_v5  ;;  %v338_v11 = vrot.slane %v329_v6, %v337_v7  ;;  %v346_v12 = vrot.slane %v329_v6, %v345_v8 }
  0x2f   : > { %524 = vmatpush1.bf16.msra.mxu0 %v1300_v27  ;;  %565 = vmatpush1.bf16.msra.mxu1 %v1301_v28 }
  0x30   : > { %525 = vmatprep.subr.bf16.mxu0 %v1302_v29  ;;  %566 = vmatprep.subr.bf16.mxu1 %v1304_v30 }
  0x33   : > { %526 = vmatpush1.bf16.msra.mxu0 %v1306_v31  ;;  %567 = vmatpush1.bf16.msra.mxu1 %v1307_v32 }
  0x34   : > { %1160 = vmatprep.subr.bf16.mxu0 %v1308_v33  ;;  %1182 = vmatprep.subr.bf16.mxu1 %v1309_v34 }
  0x36   : > { %544 = vmatmul.mubr.bf16.vlgmr.msra.gmra.mxu0 %v296_v35  ;;  %585 = vmatmul.mubr.bf16.vlgmr.msra.gmra.mxu1 %v296_v35 }
  0x37   : > { %1161 = vmatpush3.bf16.msra.mxu0 %v1310_v36  ;;  %1183 = vmatpush3.bf16.msra.mxu1 %v1311_v37 }
  0x38   : > { %1162 = vmatprep.subr.bf16.mxu0 %v1312_v38  ;;  %1184 = vmatprep.subr.bf16.mxu1 %v1313_v39  ;;  %v1155_v39 = vld [vmem:[%s1751_s4] ss:$0 sm:$0xff] }
  0x3b   : > { %1163 = vmatpush3.bf16.msra.mxu0 %v1314_v40  ;;  %1185 = vmatpush3.bf16.msra.mxu1 %v1315_v41 }
  0x3c   : > { %1164 = vmatprep.subr.bf16.mxu0 %v1316_v42  ;;  %1186 = vmatprep.subr.bf16.mxu1 %v1317_v43 }
  0x3f   : > { %1165 = vmatpush3.bf16.msra.mxu0 %v1318_v44  ;;  %1187 = vmatpush3.bf16.msra.mxu1 %v1319_v45 }
  0x40   : > { %1166 = vmatprep.subr.bf16.mxu0 %v1320_v46  ;;  %1188 = vmatprep.subr.bf16.mxu1 %v1321_v47 }
  0x43   : > { %1167 = vmatpush3.bf16.msra.mxu0 %v1322_v48  ;;  %1189 = vmatpush3.bf16.msra.mxu1 %v1323_v49 }
  0x44   : > { %1168 = vmatprep.subr.bf16.mxu0 %v1324_v50  ;;  %1190 = vmatprep.subr.bf16.mxu1 %v1325_v51 }
  0x47   : > { %1169 = vmatpush3.bf16.msra.mxu0 %v1326_v52  ;;  %1191 = vmatpush3.bf16.msra.mxu1 %v1327_v53 }
  0x48   : > { %1170 = vmatprep.subr.bf16.mxu0 %v1328_v54  ;;  %1192 = vmatprep.subr.bf16.mxu1 %v1329_v55 }
  0x4b   : > { %1171 = vmatpush3.bf16.msra.mxu0 %v1330_v56  ;;  %1193 = vmatpush3.bf16.msra.mxu1 %v1331_v57 }
  0x4c   : > { %1172 = vmatprep.subr.bf16.mxu0 %v1332_v58  ;;  %1194 = vmatprep.subr.bf16.mxu1 %v1333_v59 }
  0x4f   : > { %1173 = vmatpush3.bf16.msra.mxu0 %v1334_v60  ;;  %1195 = vmatpush3.bf16.msra.mxu1 %v1335_v61 }
  0x50   : > { %1174 = vmatprep.subr.bf16.mxu0 %v1336_v62  ;;  %1196 = vmatprep.subr.bf16.mxu1 %v1337_v63 }
  0x53   : > { %1175 = vmatpush3.bf16.msra.mxu0 %v1338_v0  ;;  %1197 = vmatpush3.bf16.msra.mxu1 %v1339_v1 }
  0xf6   : > { %v545_v13 = vpop.f32.mrf.mxu0  ;;  %v586_v14 = vpop.f32.mrf.mxu1 }
  0xf7   : > { %v546_v15 = vadd.f32 %v545_v13, %v334_v9  ;;  %v587_v16 = vadd.f32 %v586_v14, %v342_v10 }
  0xf8   : > { %v547_v17 = vpop.f32.mrf.mxu0  ;;  %v588_v18 = vpop.f32.mrf.mxu1 }
  0xf9   : > { %v548_v19 = vadd.f32 %v547_v17, %v338_v11  ;;  %v589_v20 = vadd.f32 %v588_v18, %v346_v12  ;;  %v593_v21 = vmax.f32 %v546_v15, 0.0  ;;  %v595_v22 = vmax.f32 %v587_v16, 0.0 }
  0xfa   : > { %v549_v23 = vpop.f32.mrf.mxu0  ;;  %v590_v24 = vpop.f32.mrf.mxu1 }
  0xfb   : > { %v594_v25 = vmax.f32 %v548_v19, 0.0  ;;  %v596_v26 = vmax.f32 %v589_v20, 0.0  ;;  %v597_v31 = vpack.c.bf16 %v593_v21, %v593_v21  ;;  %v599_v32 = vpack.c.bf16 %v595_v22, %v595_v22 }
  0xfc   : > { %v550_v27 = vpop.f32.mrf.mxu0  ;;  %v591_v28 = vpop.f32.mrf.mxu1 }
  0xfd   : > { %v598_v29 = vpack.c.bf16 %v594_v25, %v594_v25  ;;  %v600_v30 = vpack.c.bf16 %v596_v26, %v596_v26 }
  0xff   : > { %889 = vmatprep.mubr.bf16.mxu0 %v598_v29  ;;  %929 = vmatprep.mubr.bf16.mxu1 %v600_v30 }
 0x100   : > { %890 = vmatmul.mubr.bf16.vlgmr.msra.gmra.mxu0 %v597_v31  ;;  %930 = vmatmul.mubr.bf16.vlgmr.msra.gmra.mxu1 %v599_v32 }
 0x1c0   : > { %v1176_v33 = vpop.f32.mrf.mxu0  ;;  %v1198_v34 = vpop.f32.mrf.mxu1 }
 0x1c2   : > { %v1177_v35 = vpop.f32.mrf.mxu0  ;;  %v1199_v36 = vpop.f32.mrf.mxu1 }
 0x1c3   : > { %v1178_v37 = vadd.f32 %v1177_v35, %v1176_v33  ;;  %v1200_v38 = vadd.f32 %v1199_v36, %v1198_v34 }
 0x1c4   : > { %v1179_v40 = vpop.f32.mrf.mxu0  ;;  %v1201_v41 = vpop.f32.mrf.mxu1 }
 0x1c5   : > { %v932_v42 = vadd.f32 %v1200_v38, %v1178_v37 }
 0x1c6   : > { %v1180_v43 = vpop.f32.mrf.mxu0  ;;  %v1202_v44 = vpop.f32.mrf.mxu1 }
 0x1c7   : > { %v956_v45 = vadd.f32 %v1155_v39, %v932_v42 }
 0x1c9   : > { %957 = vst [vmem:[%s273_s13] sm:$0xff] %v956_v45 }
 0x1ca   : > { %1353 = shalt.err (!%p1350_p5)
}
 0x1cb   : > { %s1354_s7 = scalar_lea.hbm %s970_s17, 128  ;;  %s1358_s11 = scalar_lea.hbm %s1752_s5, 256 }
 0x1cc   : > { %p1355_p6 = scmp.ne.s32.totalorder %s970_s17, %s1354_s7  ;;  %p1359_p10 = scmp.lt.s32.totalorder %s970_s17, %s1752_s5 }
 0x1cd   : > { %p1360_p11 = scmp.lt.s32.totalorder %s1358_s11, %s1354_s7 }
 0x1ce   : > { %p1356_p7 = pnand %p1355_p6, %p1490_p4 }
 0x1cf   : > { %p1361_p12 = por %p1360_p11, %p1359_p10 }
 0x1d0   : > { %p1357_p9 = pneg %p1356_p7 }
 0x1d2   : > { %p1362_p13 = pnand %p1361_p12, %p1357_p9 }
 0x1d4   : > { %1365 = shalt.err (!%p1362_p13)
}
 0x1d5   : > { %1204 = dma.vmem_to_hbm [thread:$0]  (%p1490_p4), %s973_s14, 128, %s970_s17, %s959_s24  }
 0x1d6 PF: > { %p1210_p0 = scmp.ge.s32.totalorder %s1416_s23, 2  ;;  %s984_s13 = sand.u32 1, %s1396_s18  }
 0x1d7   : > { %s985_s15 = scalar_lea.sflag [#allocation4], %s984_s13 }
 0x1d8   : > { %p1207_p1 = pnand %p1210_p0, %p1497_p8 }
 0x1da   : > { %p1208_p2 = pneg %p1207_p1 }
 0x1dc   : > { %1391 = dma.done.wait (%p1208_p2), %s985_s15, 128  }
 0x1dd   : > { %1393 = vsyncadd (%p1208_p2), %s985_s15, 4294967168  ;;  %s18_s23 = sadd.s32 1, %s1416_s23   ;;  %s1755_s18 = smov %s1400_s19 }
 0x1de   : > { %p15_p3 = scmp.ge.s32.totalorder %s18_s23, 4   ;;  %s1756_s19 = smov %s1404_s20 }
 0x1df   : > { %s1757_s20 = smov %s1503_s6  ;;  %s1758_s21 = smov %s1412_s22 }
 0x1e0   : > { %s1759_s22 = smov %s1761_s26  ;;  %17 = sbr.rel (!%p15_p3) target bundleno = 4 (0x4), region = 92 }
 0x1e5   :  { %990 = vsyncpa [#allocation4], 1 }
 0x1e6   :  { %992 = vsyncpa [#allocation4 + $0x1], 1 }

</bundles_post_ra>
